<compile_context>
chip_gen: v7x
topology: tpu7x:2x2x1
jax: 0.10.0
libtpu: 0.0.40
codegen_flags: <defaults>
</compile_context>

<pallas_src>
import functools
import math

import numpy as np
import jax
import jax.numpy as jnp
from jax.experimental import pallas as pl
from jax.experimental.pallas import tpu as pltpu

_SELU_ALPHA = 1.6732632423543772
_SELU_SCALE = 1.0507009873554805
# ~2 MiB of f32 per block: with input+output double-buffered that is <= 8 MiB,
# inside v5e's 16 MiB scoped-VMEM default and v7x's smaller physical VMEM.
_TARGET_BLOCK_ELEMS = 512 * 1024
# GLU blocks get 8x sublane padding in VMEM (middle dim 2 / output dim 1), so
# use a smaller logical budget there.
_GLU_BLOCK_ELEMS = 64 * 1024


def _round_up(v, m):
    return -(-v // m) * m


def _erf(x):
    # Abramowitz & Stegun 7.1.26 polynomial (|abs err| < 1.5e-7 ~ f32 eps):
    # keeps exact-GELU semantics using only VPU/EUP ops guaranteed to lower.
    a1, a2, a3, a4, a5 = (0.254829592, -0.284496736, 1.421413741,
                          -1.453152027, 1.061405429)
    p = 0.3275911
    s = jnp.where(x >= 0.0, 1.0, -1.0)
    ax = jnp.abs(x)
    t = 1.0 / (1.0 + p * ax)
    poly = ((((a5 * t + a4) * t + a3) * t + a2) * t + a1) * t
    return s * (1.0 - poly * jnp.exp(-ax * ax))


def _sigmoid(x):
    return 1.0 / (1.0 + jnp.exp(-x))


def _elementwise_fn(act_type, kw):
    if act_type == 'relu':
        return lambda x: jnp.maximum(x, 0.0)
    if act_type == 'relu6':
        return lambda x: jnp.clip(x, 0.0, 6.0)
    if act_type == 'leakyrelu':
        slope = kw.get('negative_slope', 0.01)
        return lambda x: jnp.where(x >= 0.0, x, slope * x)
    if act_type == 'celu':
        alpha = kw.get('alpha', 1.0)
        return lambda x: jnp.where(x > 0.0, x, alpha * (jnp.exp(x / alpha) - 1.0))
    if act_type == 'elu':
        alpha = kw.get('alpha', 1.0)
        return lambda x: jnp.where(x > 0.0, x, alpha * (jnp.exp(x) - 1.0))
    if act_type == 'hardswish':
        return lambda x: x * jnp.clip(x + 3.0, 0.0, 6.0) * (1.0 / 6.0)
    if act_type == 'hardtanh':
        lo = kw.get('min_val', -1.0)
        hi = kw.get('max_val', 1.0)
        return lambda x: jnp.clip(x, lo, hi)
    if act_type == 'gelu':
        # PyTorch default approximate='none' (exact erf GELU)
        inv_sqrt2 = 1.0 / math.sqrt(2.0)
        return lambda x: 0.5 * x * (1.0 + _erf(x * inv_sqrt2))
    if act_type == 'selu':
        return lambda x: _SELU_SCALE * jnp.where(
            x > 0.0, x, _SELU_ALPHA * (jnp.exp(x) - 1.0))
    if act_type == 'silu':
        return lambda x: x * _sigmoid(x)
    if act_type == 'sigmoid':
        return _sigmoid
    if act_type == 'tanh':
        return jnp.tanh
    return None


# ---------------- layout helpers ----------------

def _as_2d(x):
    """Contiguity-preserving reshape to a lane-dense 2-D slab: (x2, pad)."""
    n = x.size
    for w in (1024, 512, 256, 128):
        if n % w == 0:
            return x.reshape(n // w, w), 0
    # Rare ragged fallback (total size not a multiple of 128): tail-pad.
    # TODO(synk): this fallback materializes one extra HBM copy via jnp.pad.
    w = 128
    pad = (-n) % w
    x2 = jnp.pad(x.reshape(-1), (0, pad)).reshape(-1, w)
    return x2, pad


def _row_block(rows, lane_w):
    """Row-block (multiple of 8, ~2 MiB f32) and the grid length over rows."""
    br = max(8, min(4096, (_TARGET_BLOCK_ELEMS // max(lane_w, 1)) // 8 * 8))
    if rows <= br:
        return rows, 1          # full-extent block: always a legal block shape
    return br, pl.cdiv(rows, br)


# ---------------- elementwise kernel ----------------

def _ew_kernel(x_ref, o_ref, *, fn):
    o_ref[...] = fn(x_ref[...])


def _run_elementwise(x, fn):
    n = x.size
    x2, pad = _as_2d(x)
    rows, w = x2.shape
    br, steps = _row_block(rows, w)
    out = pl.pallas_call(
        functools.partial(_ew_kernel, fn=fn),
        out_shape=jax.ShapeDtypeStruct((rows, w), x.dtype),
        grid=(steps,),
        in_specs=[pl.BlockSpec((br, w), lambda i: (i, 0))],
        out_specs=pl.BlockSpec((br, w), lambda i: (i, 0)),
        compiler_params=pltpu.CompilerParams(dimension_semantics=("parallel",)),
    )(x2)
    if pad:
        return out.reshape(-1)[:n].reshape(x.shape)
    return out.reshape(x.shape)


# ---------------- PReLU kernel (scalar weight in SMEM) ----------------

def _prelu_kernel(x_ref, w_ref, o_ref):
    x = x_ref[...]
    w = w_ref[0, 0]
    o_ref[...] = jnp.where(x >= 0.0, x, w * x)


def _run_prelu(x, weight):
    n = x.size
    x2, pad = _as_2d(x)
    rows, w = x2.shape
    br, steps = _row_block(rows, w)
    out = pl.pallas_call(
        _prelu_kernel,
        out_shape=jax.ShapeDtypeStruct((rows, w), x.dtype),
        grid=(steps,),
        in_specs=[
            pl.BlockSpec((br, w), lambda i: (i, 0)),
            pl.BlockSpec(memory_space=pltpu.MemorySpace.SMEM),
        ],
        out_specs=pl.BlockSpec((br, w), lambda i: (i, 0)),
        compiler_params=pltpu.CompilerParams(dimension_semantics=("parallel",)),
    )(x2, weight.reshape(1, 1).astype(x.dtype))
    if pad:
        return out.reshape(-1)[:n].reshape(x.shape)
    return out.reshape(x.shape)


# ---------------- softmax kernels ----------------

def _softmax_lane_kernel(x_ref, o_ref):
    # block (rows, K): reduce over the lane axis
    x = x_ref[...].astype(jnp.float32)
    m = jnp.max(x, axis=-1, keepdims=True)
    e = jnp.exp(x - m)
    o_ref[...] = (e / jnp.sum(e, axis=-1, keepdims=True)).astype(o_ref.dtype)


def _softmax_sublane_kernel(x_ref, o_ref):
    # block (To, K, Tinner): reduce over the sublane axis (K), lanes stay dense
    x = x_ref[...].astype(jnp.float32)
    m = jnp.max(x, axis=1, keepdims=True)
    e = jnp.exp(x - m)
    o_ref[...] = (e / jnp.sum(e, axis=1, keepdims=True)).astype(o_ref.dtype)


def _run_softmax(x, dim):
    if dim is None:
        # PyTorch's deprecated implicit-dim rule: 0 for 0/1/3-D, else 1.
        dim = 0 if x.ndim in (0, 1, 3) else 1
    dim = dim % x.ndim
    shape = x.shape
    K = shape[dim]
    outer = math.prod(shape[:dim])
    inner = math.prod(shape[dim + 1:])

    if inner == 1:
        # Reduced axis is (effectively) last: reduce over lanes.
        x2 = x.reshape(outer, K)
        br, steps = _row_block(outer, K)
        out = pl.pallas_call(
            _softmax_lane_kernel,
            out_shape=jax.ShapeDtypeStruct((outer, K), x.dtype),
            grid=(steps,),
            in_specs=[pl.BlockSpec((br, K), lambda i: (i, 0))],
            out_specs=pl.BlockSpec((br, K), lambda i: (i, 0)),
            compiler_params=pltpu.CompilerParams(
                dimension_semantics=("parallel",)),
        )(x2)
        return out.reshape(shape)

    # Middle-axis softmax (e.g. NCHW channels): K on sublanes, inner on lanes.
    x3 = x.reshape(outer, K, inner)
    k_pad = _round_up(K, 8)                       # VMEM sublane padding
    if inner >= 128:
        tile = min(inner // 128 * 128,
                   max(128, (_TARGET_BLOCK_ELEMS // k_pad) // 128 * 128))
    else:
        tile = inner                              # full lane extent (legal)
    to = max(1, min(outer, _TARGET_BLOCK_ELEMS // (k_pad * tile)))
    grid = (pl.cdiv(outer, to), pl.cdiv(inner, tile))
    out = pl.pallas_call(
        _softmax_sublane_kernel,
        out_shape=jax.ShapeDtypeStruct((outer, K, inner), x.dtype),
        grid=grid,
        in_specs=[pl.BlockSpec((to, K, tile), lambda o, j: (o, 0, j))],
        out_specs=pl.BlockSpec((to, K, tile), lambda o, j: (o, 0, j)),
        compiler_params=pltpu.CompilerParams(
            dimension_semantics=("parallel", "parallel")),
    )(x3)
    return out.reshape(shape)


# ---------------- GLU kernel ----------------

def _glu_kernel(x_ref, o_ref):
    x = x_ref[...]                 # (To, 2, Tm): halves live on two sublane rows
    a = x[:, 0:1, :]
    b = x[:, 1:2, :]
    o_ref[...] = a * _sigmoid(b)


def _run_glu(x, dim):
    dim = dim % x.ndim
    shape = x.shape
    K = shape[dim]
    assert K % 2 == 0, "GLU requires an even split dimension"
    half_k = K // 2
    outer = math.prod(shape[:dim])
    inner = math.prod(shape[dim + 1:])
    half_m = half_k * inner
    # Contiguous view: the two halves along `dim` are the two rows of axis 1.
    x3 = x.reshape(outer, 2, half_m)

    if half_m >= 128:
        tile_m = min(half_m // 128 * 128, 2048)
    else:
        tile_m = half_m                          # full lane extent (legal)
    cap_o = max(1, _GLU_BLOCK_ELEMS // tile_m)
    to = outer if outer <= cap_o else max(8, cap_o // 8 * 8)
    grid = (pl.cdiv(outer, to), pl.cdiv(half_m, tile_m))

    out = pl.pallas_call(
        _glu_kernel,
        out_shape=jax.ShapeDtypeStruct((outer, 1, half_m), x.dtype),
        grid=grid,
        in_specs=[pl.BlockSpec((to, 2, tile_m), lambda i, j: (i, 0, j))],
        out_specs=pl.BlockSpec((to, 1, tile_m), lambda i, j: (i, 0, j)),
        compiler_params=pltpu.CompilerParams(
            dimension_semantics=("parallel", "parallel")),
    )(x3)
    return out.reshape(shape[:dim] + (half_k,) + shape[dim + 1:])


# ---------------- module port ----------------

class Activation:
    """JAX/Pallas port of the PyTorch Activation module (forward pass)."""

    _HUB = {'relu', 'relu6', 'leakyrelu', 'prelu', 'celu', 'elu', 'hardswish',
            'hardtanh', 'gelu', 'glu', 'selu', 'silu', 'sigmoid', 'softmax',
            'tanh', 'none'}

    def __init__(self, act_type, **kwargs):
        act_type = act_type.lower()
        if act_type not in self._HUB:
            raise NotImplementedError(f'Unsupport activation type: {act_type}')
        self.act_type = act_type
        self.kwargs = kwargs
        if act_type == 'prelu':
            num_parameters = kwargs.get('num_parameters', 1)
            init = kwargs.get('init', 0.25)
            if num_parameters != 1:
                # TODO(synk): per-channel PReLU (num_parameters=C) would need a
                # channel-indexed weight BlockSpec; only scalar supported.
                raise NotImplementedError('Only num_parameters=1 PReLU supported')
            self.weight = jnp.full((1,), init, dtype=jnp.float32)

    def __call__(self, x):
        t = self.act_type
        if t == 'none':
            return x                                 # identity: no kernel launch
        if t == 'prelu':
            return _run_prelu(x, self.weight)
        if t == 'softmax':
            return _run_softmax(x, self.kwargs.get('dim', None))
        if t == 'glu':
            return _run_glu(x, self.kwargs.get('dim', -1))
        return _run_elementwise(x, _elementwise_fn(t, self.kwargs))


if __name__ == "__main__":
    key = jax.random.PRNGKey(0)
    x = jax.random.normal(key, (2, 4, 16, 16), dtype=jnp.float32)
    xn = np.asarray(x)

    names = ['relu', 'relu6', 'leakyrelu', 'celu', 'elu', 'hardswish',
             'hardtanh', 'gelu', 'selu', 'silu', 'sigmoid', 'tanh', 'none',
             'prelu', 'softmax', 'glu']
    results = {}
    for name in names:
        y = Activation(name)(x)
        jax.block_until_ready(y)
        results[name] = y

    sig = 1.0 / (1.0 + np.exp(-xn))
    np.testing.assert_allclose(np.asarray(results['relu']),
                               np.maximum(xn, 0.0), rtol=1e-6, atol=1e-6)
    np.testing.assert_allclose(np.asarray(results['leakyrelu']),
                               np.where(xn >= 0.0, xn, 0.01 * xn),
                               rtol=1e-6, atol=1e-6)
    np.testing.assert_allclose(np.asarray(results['silu']), xn * sig,
                               rtol=1e-5, atol=1e-6)
    np.testing.assert_allclose(np.asarray(results['prelu']),
                               np.where(xn >= 0.0, xn, 0.25 * xn),
                               rtol=1e-6, atol=1e-6)
    np.testing.assert_allclose(np.asarray(results['gelu']),
                               np.asarray(jax.nn.gelu(x, approximate=False)),
                               rtol=1e-4, atol=1e-5)
    np.testing.assert_allclose(np.asarray(results['softmax']),
                               np.asarray(jax.nn.softmax(x, axis=1)),
                               rtol=1e-5, atol=1e-6)
    assert results['softmax'].shape == x.shape
    assert results['glu'].shape == (2, 4, 16, 8)
    np.testing.assert_allclose(np.asarray(results['glu']),
                               xn[..., :8] * (1.0 / (1.0 + np.exp(-xn[..., 8:]))),
                               rtol=1e-5, atol=1e-6)

    # Exercise the lane-reduce softmax and channel-split GLU paths too.
    y_sm_last = Activation('softmax', dim=-1)(x)
    jax.block_until_ready(y_sm_last)
    np.testing.assert_allclose(np.asarray(y_sm_last),
                               np.asarray(jax.nn.softmax(x, axis=-1)),
                               rtol=1e-5, atol=1e-6)
    y_glu_c = Activation('glu', dim=1)(x)
    jax.block_until_ready(y_glu_c)
    assert y_glu_c.shape == (2, 2, 16, 16)
    np.testing.assert_allclose(np.asarray(y_glu_c),
                               xn[:, :2] * (1.0 / (1.0 + np.exp(-xn[:, 2:]))),
                               rtol=1e-5, atol=1e-6)

    print("KERNEL_OK")
</pallas_src>

<mosaic_0001>
module attributes {stable_mosaic.version = 11 : i64} {
  func.func @_ew_kernel(%arg0: i32, %arg1: memref<2x1024xf32, #tpu.memory_space<vmem>>, %arg2: memref<2x1024xf32, #tpu.memory_space<vmem>>) attributes {dimension_semantics = [#tpu.dimension_semantics<parallel>], iteration_bounds = array<i64: 1>, scalar_prefetch = 0 : i64, scratch_operands = 0 : i64, tpu.core_type = #tpu.core_type<tc>, window_params = [{transform_indices = @transform_0, window_bounds = array<i64: 2, 1024>}, {transform_indices = @transform_1, window_bounds = array<i64: 2, 1024>}]} {
    %c0 = arith.constant 0 : index
    %c0_0 = arith.constant 0 : index
    %0 = vector.load %arg1[%c0, %c0_0] : memref<2x1024xf32, #tpu.memory_space<vmem>>, vector<2x1024xf32>
    %cst = arith.constant 0.000000e+00 : f32
    %1 = vector.broadcast %cst : f32 to vector<2x1024xf32>
    %2 = arith.maximumf %0, %1 : vector<2x1024xf32>
    %c0_1 = arith.constant 0 : index
    %c0_2 = arith.constant 0 : index
    %3 = vector.load %arg2[%c0_1, %c0_2] : memref<2x1024xf32, #tpu.memory_space<vmem>>, vector<2x1024xf32>
    tpu.vector_store %arg2[%c0_1, %c0_2], %2 {strides = array<i32>} : memref<2x1024xf32, #tpu.memory_space<vmem>>, vector<2x1024xf32>,
    return
  }
  func.func @transform_0(%arg0: i32) -> (i32, i32) {
    %c0_i32 = arith.constant 0 : i32
    %c0_i32_0 = arith.constant 0 : i32
    return %arg0, %c0_i32 : i32, i32
  }
  func.func @transform_1(%arg0: i32) -> (i32, i32) {
    %c0_i32 = arith.constant 0 : i32
    %c0_i32_0 = arith.constant 0 : i32
    return %arg0, %c0_i32 : i32, i32
  }
}

</mosaic_0001>

<bundles_post_ra>
// kernel: tpu_custom_call.1
= control target key start
LH: loop header
LB: loop body
LE: loop exit
PB: predicated region body
PF: predicated region fallthrough
CT: control target
= control target key end

     0   :  { %6 = vsyncpa [#allocation3], 0  ;;  %s128_s0 = inlined_call_operand.hbm [shape: f32[2,1024], index: 0, kind: input, shape index: {}]   ;;  %s129_s1 = inlined_call_operand.hbm [shape: f32[2,1024], index: 1, kind: output, shape index: {}]  }
   0x1   :  { %7 = vsyncpa [#allocation4], 0  ;;  %s92_s6 = smov [#allocation2]   ;;  %s44_s10 = scalar_lea.hbm %s128_s0, 256 }
   0x2   :  { %s14_s7 = sshll.u32 %s92_s6, 4  ;;  %p45_p0 = scmp.ne.s32.totalorder %s128_s0, %s44_s10  ;;  %s15_s7 = int_to_ptr.vmem [resolvable:$true] %s14_s7 }
   0x3   :  { %p48_p1 = scmp.lt.u32.totalorder %s44_s10, %s128_s0 }
   0x5   :  { %p50_p2 = pnand %p48_p1, %p45_p0 }
   0x7   :  { %53 = shalt.err (!%p50_p2)
}
   0x8   :  { %s54_s15 = scalar_lea.vmem %s15_s7, 256  ;;  %p59_p4 = scmp.lt.s32.totalorder %s15_s7, %s15_s7 }
   0x9   :  { %p55_p3 = scmp.ne.s32.totalorder %s15_s7, %s54_s15  ;;  %p60_p5 = scmp.lt.s32.totalorder %s54_s15, %s54_s15 }
   0xb   :  { %p61_p6 = por %p60_p5, %p59_p4 }
   0xd   :  { %p62_p7 = pnand %p61_p6, %p55_p3 }
   0xf   :  { %65 = shalt.err (!%p62_p7)
}
  0x10   :  { %17 = dma.hbm_to_vmem [thread:$0]  %s128_s0, 256, %s15_s7, [#allocation3]  }
  0x11   :  { %88 = dma.done.wait [#allocation3], 256  }
  0x12   :  { %89 = vsyncadd [#allocation3], 4294967040  ;;  %s93_s18 = smov [#allocation5]   ;;  %v21_v0 = vld [vmem:[#allocation2] sm:$0xff]  ;;  %v22_v1 = vld [vmem:[#allocation2 + $0x8] sm:$0xff] }
  0x13   :  { %s33_s19 = sshll.u32 %s93_s18, 4  ;;  %v23_v2 = vmax.f32 %v21_v0, 0.0  ;;  %v24_v3 = vmax.f32 %v22_v1, 0.0  ;;  %s34_s19 = int_to_ptr.vmem [resolvable:$true] %s33_s19 }
  0x14   :  { %s66_s20 = scalar_lea.vmem %s34_s19, 256  ;;  %p71_p9 = scmp.lt.s32.totalorder %s34_s19, %s34_s19 }
  0x15   :  { %25 = vst [vmem:[#allocation5] sm:$0xff] %v23_v2  ;;  %26 = vst [vmem:[#allocation5 + $0x8] sm:$0xff] %v24_v3  ;;  %p67_p8 = scmp.ne.s32.totalorder %s34_s19, %s66_s20  ;;  %p72_p10 = scmp.lt.s32.totalorder %s66_s20, %s66_s20 }
  0x17   :  { %p73_p11 = por %p72_p10, %p71_p9 }
  0x19   :  { %p74_p12 = pnand %p73_p11, %p67_p8 }
  0x1b   :  { %77 = shalt.err (!%p74_p12)
}
  0x1c   :  { %s78_s22 = scalar_lea.hbm %s129_s1, 256 }
  0x1d   :  { %p79_p13 = scmp.ne.s32.totalorder %s129_s1, %s78_s22  ;;  %p82_p0 = scmp.lt.u32.totalorder %s78_s22, %s129_s1 }
  0x1f   :  { %p84_p1 = pnand %p82_p0, %p79_p13 }
  0x21   :  { %87 = shalt.err (!%p84_p1)
}
  0x22   :  { %36 = dma.vmem_to_hbm [thread:$0]  %s34_s19, 256, %s129_s1, [#allocation4]  }
  0x23   :  { %90 = dma.done.wait [#allocation4], 256  }
  0x24   :  { %91 = vsyncadd [#allocation4], 4294967040 }
  0x25   :  { %40 = vsyncpa [#allocation3], 1 }
  0x26   :  { %41 = vsyncpa [#allocation4], 1 }

</bundles_post_ra>
